<compile_context>
chip_gen: v7x
topology: tpu7x:2x2x1
jax: 0.10.0
libtpu: 0.0.40
codegen_flags: <defaults>
</compile_context>

<pallas_src>
import jax
import jax.numpy as jnp
from jax.experimental import pallas as pl


def conv1x1_relu_sigmoid_kernel(x_ref, w_ref, b_ref, o_ref):
    # x_ref: (C_in, M)  channels-first pixel matrix (M = N*H*W on the lane axis)
    # w_ref: (C_out, C_in)
    # b_ref: (C_out, 1)
    # o_ref: (C_out, M)
    x = x_ref[...]
    w = w_ref[...]
    c_in = x_ref.shape[0]

    # bias broadcast over the lane (pixel) axis
    acc = jnp.broadcast_to(b_ref[...], o_ref.shape).astype(jnp.float32)

    # K = C_in (= 3) contraction on the VPU: per input channel, broadcast the
    # (C_out, 1) weight column over lanes and the (1, M) pixel row over
    # sublanes, then multiply-accumulate. No MXU needed for K this small.
    for c in range(c_in):
        acc = acc + w[:, c : c + 1] * x[c : c + 1, :]

    acc = jnp.maximum(acc, 0.0)                           # relu
    o_ref[...] = jax.nn.sigmoid(acc).astype(o_ref.dtype)  # sigmoid


def conv_transpose1x1_relu_sigmoid(x_nchw, weight, bias):
    """x_nchw: (N, C_in, H, W) f32; weight: (C_in, C_out, 1, 1); bias: (C_out,)."""
    N, C_in, H, W = x_nchw.shape
    C_out = weight.shape[1]
    M = N * H * W

    # Channels-first pixel matrix (C_in, N*H*W). For N == 1 the transpose is a
    # permutation over a size-1 axis, i.e. free; the reshape is layout-preserving.
    x_cf = jnp.transpose(x_nchw, (1, 0, 2, 3)).reshape(C_in, M)
    w_t = weight[:, :, 0, 0].T            # (C_out, C_in)
    b_col = bias.reshape(C_out, 1)        # (C_out, 1)

    # Single whole-array block: ~48 KiB in + ~128 KiB out + <1 KiB params,
    # orders of magnitude below VMEM on every TPU generation.
    out_cf = pl.pallas_call(
        conv1x1_relu_sigmoid_kernel,
        out_shape=jax.ShapeDtypeStruct((C_out, M), x_nchw.dtype),
        grid=(1,),
        in_specs=[
            pl.BlockSpec((C_in, M), lambda i: (0, 0)),
            pl.BlockSpec((C_out, C_in), lambda i: (0, 0)),
            pl.BlockSpec((C_out, 1), lambda i: (0, 0)),
        ],
        out_specs=pl.BlockSpec((C_out, M), lambda i: (0, 0)),
    )(x_cf, w_t, b_col)

    # (C_out, N*H*W) -> NCHW; again a no-op permutation for N == 1.
    return jnp.transpose(out_cf.reshape(C_out, N, H, W), (1, 0, 2, 3))


def reference(x_nchw, weight, bias):
    """Pure-JAX reference of the same math for a correctness check."""
    w2d = weight[:, :, 0, 0]
    y = jnp.einsum("nihw,io->nohw", x_nchw, w2d) + bias[None, :, None, None]
    return jax.nn.sigmoid(jnp.maximum(y, 0.0))


if __name__ == "__main__":
    key = jax.random.PRNGKey(0)
    k_x, k_w, k_b = jax.random.split(key, 3)

    # Input matching the module's x1 = torch.randn(1, 3, 64, 64)
    x1 = jax.random.normal(k_x, (1, 3, 64, 64), dtype=jnp.float32)

    # Deterministic parameter init for ConvTranspose2d(3, 8, 1):
    # weight shape (in_ch, out_ch, kH, kW) = (3, 8, 1, 1), bias shape (8,)
    fan_in = 3 * 1 * 1
    bound = 1.0 / jnp.sqrt(fan_in)
    weight = jax.random.uniform(k_w, (3, 8, 1, 1), jnp.float32, -bound, bound)
    bias = jax.random.uniform(k_b, (8,), jnp.float32, -bound, bound)

    out = conv_transpose1x1_relu_sigmoid(x1, weight, bias)
    out = jax.block_until_ready(out)

    ref = jax.block_until_ready(reference(x1, weight, bias))
    assert out.shape == (1, 8, 64, 64)
    assert jnp.max(jnp.abs(out - ref)) < 1e-5

    print("KERNEL_OK")
</pallas_src>

<mosaic_0001>
module attributes {stable_mosaic.version = 11 : i64} {
  func.func @conv1x1_relu_sigmoid_kernel(%arg0: i32, %arg1: memref<3x4096xf32, #tpu.memory_space<vmem>>, %arg2: memref<8x3xf32, #tpu.memory_space<vmem>>, %arg3: memref<8x1xf32, #tpu.memory_space<vmem>>, %arg4: memref<8x4096xf32, #tpu.memory_space<vmem>>) attributes {dimension_semantics = [#tpu.dimension_semantics<arbitrary>], iteration_bounds = array<i64: 1>, scalar_prefetch = 0 : i64, scratch_operands = 0 : i64, tpu.core_type = #tpu.core_type<tc>, window_params = [{pipeline_mode = #tpu.pipeline_mode<synchronous>, transform_indices = @transform_0, window_bounds = array<i64: 3, 4096>}, {pipeline_mode = #tpu.pipeline_mode<synchronous>, transform_indices = @transform_1, window_bounds = array<i64: 8, 3>}, {pipeline_mode = #tpu.pipeline_mode<synchronous>, transform_indices = @transform_2, window_bounds = array<i64: 8, 1>}, {pipeline_mode = #tpu.pipeline_mode<synchronous>, transform_indices = @transform_3, window_bounds = array<i64: 8, 4096>}]} {
    %c0 = arith.constant 0 : index
    %c0_0 = arith.constant 0 : index
    %0 = vector.load %arg1[%c0, %c0_0] : memref<3x4096xf32, #tpu.memory_space<vmem>>, vector<3x4096xf32>
    %c0_1 = arith.constant 0 : index
    %c0_2 = arith.constant 0 : index
    %1 = vector.load %arg2[%c0_1, %c0_2] : memref<8x3xf32, #tpu.memory_space<vmem>>, vector<8x3xf32>
    %c0_3 = arith.constant 0 : index
    %c0_4 = arith.constant 0 : index
    %2 = vector.load %arg3[%c0_3, %c0_4] : memref<8x1xf32, #tpu.memory_space<vmem>>, vector<8x1xf32>
    %3 = vector.shape_cast %2 : vector<8x1xf32> to vector<8x1xf32>
    %4 = vector.broadcast %3 : vector<8x1xf32> to vector<8x4096xf32>
    %5 = vector.extract_strided_slice %1 {offsets = [0, 0], sizes = [8, 1], strides = [1, 1]} : vector<8x3xf32> to vector<8x1xf32>
    %6 = vector.extract_strided_slice %0 {offsets = [0, 0], sizes = [1, 4096], strides = [1, 1]} : vector<3x4096xf32> to vector<1x4096xf32>
    %7 = vector.broadcast %5 : vector<8x1xf32> to vector<8x4096xf32>
    %8 = vector.broadcast %6 : vector<1x4096xf32> to vector<8x4096xf32>
    %9 = arith.mulf %7, %8 : vector<8x4096xf32>
    %10 = arith.addf %4, %9 : vector<8x4096xf32>
    %11 = vector.extract_strided_slice %1 {offsets = [0, 1], sizes = [8, 1], strides = [1, 1]} : vector<8x3xf32> to vector<8x1xf32>
    %12 = vector.extract_strided_slice %0 {offsets = [1, 0], sizes = [1, 4096], strides = [1, 1]} : vector<3x4096xf32> to vector<1x4096xf32>
    %13 = vector.broadcast %11 : vector<8x1xf32> to vector<8x4096xf32>
    %14 = vector.broadcast %12 : vector<1x4096xf32> to vector<8x4096xf32>
    %15 = arith.mulf %13, %14 : vector<8x4096xf32>
    %16 = arith.addf %10, %15 : vector<8x4096xf32>
    %17 = vector.extract_strided_slice %1 {offsets = [0, 2], sizes = [8, 1], strides = [1, 1]} : vector<8x3xf32> to vector<8x1xf32>
    %18 = vector.extract_strided_slice %0 {offsets = [2, 0], sizes = [1, 4096], strides = [1, 1]} : vector<3x4096xf32> to vector<1x4096xf32>
    %19 = vector.broadcast %17 : vector<8x1xf32> to vector<8x4096xf32>
    %20 = vector.broadcast %18 : vector<1x4096xf32> to vector<8x4096xf32>
    %21 = arith.mulf %19, %20 : vector<8x4096xf32>
    %22 = arith.addf %16, %21 : vector<8x4096xf32>
    %cst = arith.constant 0.000000e+00 : f32
    %23 = vector.broadcast %cst : f32 to vector<8x4096xf32>
    %24 = arith.maximumf %22, %23 : vector<8x4096xf32>
    %25 = arith.negf %24 : vector<8x4096xf32>
    %26 = math.exp %25 : vector<8x4096xf32>
    %cst_5 = arith.constant 1.000000e+00 : f32
    %27 = vector.broadcast %cst_5 : f32 to vector<8x4096xf32>
    %28 = arith.addf %27, %26 : vector<8x4096xf32>
    %29 = arith.divf %27, %28 : vector<8x4096xf32>
    %c0_6 = arith.constant 0 : index
    %c0_7 = arith.constant 0 : index
    %30 = vector.load %arg4[%c0_6, %c0_7] : memref<8x4096xf32, #tpu.memory_space<vmem>>, vector<8x4096xf32>
    tpu.vector_store %arg4[%c0_6, %c0_7], %29 {strides = array<i32>} : memref<8x4096xf32, #tpu.memory_space<vmem>>, vector<8x4096xf32>,
    return
  }
  func.func @transform_0(%arg0: i32) -> (i32, i32) {
    %c0_i32 = arith.constant 0 : i32
    %c0_i32_0 = arith.constant 0 : i32
    %c0_i32_1 = arith.constant 0 : i32
    return %c0_i32, %c0_i32_0 : i32, i32
  }
  func.func @transform_1(%arg0: i32) -> (i32, i32) {
    %c0_i32 = arith.constant 0 : i32
    %c0_i32_0 = arith.constant 0 : i32
    %c0_i32_1 = arith.constant 0 : i32
    return %c0_i32, %c0_i32_0 : i32, i32
  }
  func.func @transform_2(%arg0: i32) -> (i32, i32) {
    %c0_i32 = arith.constant 0 : i32
    %c0_i32_0 = arith.constant 0 : i32
    %c0_i32_1 = arith.constant 0 : i32
    return %c0_i32, %c0_i32_0 : i32, i32
  }
  func.func @transform_3(%arg0: i32) -> (i32, i32) {
    %c0_i32 = arith.constant 0 : i32
    %c0_i32_0 = arith.constant 0 : i32
    %c0_i32_1 = arith.constant 0 : i32
    return %c0_i32, %c0_i32_0 : i32, i32
  }
}

</mosaic_0001>

<bundles_post_ra>
// kernel: tpu_custom_call.1
= control target key start
LH: loop header
LB: loop body
LE: loop exit
PB: predicated region body
PF: predicated region fallthrough
CT: control target
= control target key end

     0   :  { %8 = vsyncpa [#allocation3], 0  ;;  %s2561_s0 = inlined_call_operand.hbm [shape: f32[3,4096], index: 0, kind: input, shape index: {}]   ;;  %s2562_s1 = inlined_call_operand.vmem [shape: f32[8,3], index: 1, kind: input, shape index: {}]   ;;  %s2563_s2 = inlined_call_operand.vmem [shape: f32[8,1], index: 2, kind: input, shape index: {}]   ;;  %s2564_s3 = inlined_call_operand.hbm [shape: f32[8,4096], index: 3, kind: output, shape index: {}]  }
   0x1   :  { %9 = vsyncpa [#allocation4], 0  ;;  %s1623_s12 = smov [#allocation2]   ;;  %s1575_s16 = scalar_lea.hbm %s2561_s0, 2048 }
   0x2   :  { %s16_s13 = sshll.u32 %s1623_s12, 4  ;;  %p1576_p0 = scmp.ne.s32.totalorder %s2561_s0, %s1575_s16  ;;  %s17_s13 = int_to_ptr.vmem [resolvable:$true] %s16_s13 }
   0x3   :  { %p1579_p1 = scmp.lt.u32.totalorder %s1575_s16, %s2561_s0 }
   0x5   :  { %p1581_p2 = pnand %p1579_p1, %p1576_p0 }
   0x7   :  { %1584 = shalt.err (!%p1581_p2)
}
   0x8   :  { %s1585_s21 = scalar_lea.vmem %s17_s13, 2048  ;;  %p1590_p4 = scmp.lt.s32.totalorder %s17_s13, %s17_s13 }
   0x9   :  { %p1586_p3 = scmp.ne.s32.totalorder %s17_s13, %s1585_s21  ;;  %p1591_p5 = scmp.lt.s32.totalorder %s1585_s21, %s1585_s21 }
   0xb   :  { %p1592_p6 = por %p1591_p5, %p1590_p4 }
   0xd   :  { %p1593_p7 = pnand %p1592_p6, %p1586_p3 }
   0xf   :  { %1596 = shalt.err (!%p1593_p7)
}
  0x10   :  { %19 = dma.hbm_to_vmem [thread:$0]  %s2561_s0, 2048, %s17_s13, [#allocation3]  }
  0x11   :  { %1619 = dma.done.wait [#allocation3], 2048  }
  0x12   :  { %1620 = vsyncadd [#allocation3], 4294965248  ;;  %v1624_v0 = vmov 0   ;;  %v1625_v1 = vmov 1   ;;  %v43_v2 = vld [vmem:[%s2562_s1] sm:$0xff]  ;;  %v1626_v4 = vmov 2   ;;  %v71_v5 = vlaneseq }
  0x13   :  { %1443 = vset.pattern.permute.xlu0 %v1624_v0  ;;  %1444 = vset.pattern.permute.xlu1 %v1625_v1  ;;  %v44_v3 = vld [vmem:[%s2563_s2] sm:$0xff]  ;;  %v1676_v10 = vld [vmem:[#allocation2 + $0x8] sm:$0x77]  ;;  %v1678_v11 = vld [vmem:[#allocation2 + $0x10] sm:$0x77]  ;;  %s1627_s0 = smov [#allocation5]  }
  0x14   :  { %52 = vperm.xlu0 %1443, %v43_v2   ;;  %424 = vperm.xlu1 %1444, %v43_v2   ;;  %v1666_v6 = vshrl.u32 %v71_v5, 7  ;;  %v1674_v9 = vld [vmem:[#allocation2] sm:$0x77]  ;;  %v1683_v13 = vld [vmem:[#allocation2 + $0x18] sm:$0x77]  ;;  %s1397_s1 = sshll.u32 %s1627_s0, 4  ;;  %s1398_s1 = int_to_ptr.vmem [resolvable:$true] %s1397_s1 }
  0x15   :  { %v1685_v14 = vld [vmem:[#allocation2 + $0x20] sm:$0x77]  ;;  %v1693_v17 = vld [vmem:[#allocation2 + $0x28] sm:$0x77]  ;;  %v1695_v18 = vld [vmem:[#allocation2 + $0x30] sm:$0x77]  ;;  %p1602_p9 = scmp.lt.s32.totalorder %s1398_s1, %s1398_s1 }
  0x16   :  { %v1669_v7 = vsub.s32 0, %v1666_v6  ;;  %v1672_v8 = vsub.s32 4, %v1666_v6  ;;  %v1681_v12 = vsub.s32 1, %v1666_v6  ;;  %v1688_v15 = vsub.s32 5, %v1666_v6  ;;  %v1699_v20 = vld [vmem:[#allocation2 + $0x38] sm:$0x77] }
  0x17   :  { %v1691_v16 = vsub.s32 2, %v1666_v6  ;;  %v1701_v21 = vld [vmem:[#allocation2 + $0x40] sm:$0x77]  ;;  %v1711_v26 = vld [vmem:[#allocation2 + $0x48] sm:$0x77]  ;;  %s1597_s2 = scalar_lea.vmem %s1398_s1, 4096 }
  0x18   :  { %47 = vperm.xlu0 %1443, %v44_v3   ;;  %1445 = vset.pattern.permute.xlu1 %v1626_v4  ;;  %v74_v19 = vrot.slane %v1674_v9, %v1669_v7  ;;  %v78_v22 = vrot.slane %v1674_v9, %v1672_v8  ;;  %v82_v23 = vrot.slane %v1676_v10, %v1669_v7  ;;  %v1713_v27 = vld [vmem:[#allocation2 + $0x50] sm:$0x77]  ;;  %v1723_v32 = vld [vmem:[#allocation2 + $0x58] sm:$0x77]  ;;  %v1725_v33 = vld [vmem:[#allocation2 + $0x60] sm:$0x77]  ;;  %p1598_p8 = scmp.ne.s32.totalorder %s1398_s1, %s1597_s2  ;;  %p1603_p10 = scmp.lt.s32.totalorder %s1597_s2, %s1597_s2 }
  0x19   :  { %780 = vperm.xlu1 %1445, %v43_v2   ;;  %v86_v24 = vrot.slane %v1676_v10, %v1672_v8  ;;  %v90_v25 = vrot.slane %v1678_v11, %v1669_v7  ;;  %v94_v28 = vrot.slane %v1678_v11, %v1672_v8  ;;  %v98_v29 = vrot.slane %v1683_v13, %v1669_v7  ;;  %v1735_v38 = vld [vmem:[#allocation2 + $0x68] sm:$0x77]  ;;  %v1737_v39 = vld [vmem:[#allocation2 + $0x70] sm:$0x77]  ;;  %v1747_v44 = vld [vmem:[#allocation2 + $0x78] sm:$0x77] }
  0x1a   :  { %v102_v30 = vrot.slane %v1683_v13, %v1672_v8  ;;  %v106_v31 = vrot.slane %v1685_v14, %v1669_v7  ;;  %v110_v34 = vrot.slane %v1685_v14, %v1672_v8  ;;  %v114_v35 = vrot.slane %v1693_v17, %v1669_v7  ;;  %p1604_p11 = por %p1603_p10, %p1602_p9 }
  0x1b   :  { %v118_v36 = vrot.slane %v1693_v17, %v1672_v8  ;;  %v122_v37 = vrot.slane %v1695_v18, %v1669_v7  ;;  %v126_v40 = vrot.slane %v1695_v18, %v1672_v8  ;;  %v130_v41 = vrot.slane %v1699_v20, %v1669_v7 }
  0x1c   :  { %1446 = vset.pattern.permute.xlu0 %v1626_v4  ;;  %v134_v42 = vrot.slane %v1699_v20, %v1672_v8  ;;  %v138_v43 = vrot.slane %v1701_v21, %v1669_v7  ;;  %v142_v45 = vrot.slane %v1701_v21, %v1672_v8  ;;  %v146_v46 = vrot.slane %v1711_v26, %v1669_v7  ;;  %p1605_p12 = pnand %p1604_p11, %p1598_p8 }
  0x1d   :  { %v150_v47 = vrot.slane %v1711_v26, %v1672_v8  ;;  %v154_v48 = vrot.slane %v1713_v27, %v1669_v7  ;;  %v158_v49 = vrot.slane %v1713_v27, %v1672_v8  ;;  %v162_v50 = vrot.slane %v1723_v32, %v1669_v7 }
  0x1e   :  { %v166_v51 = vrot.slane %v1723_v32, %v1672_v8  ;;  %v170_v52 = vrot.slane %v1725_v33, %v1669_v7  ;;  %v174_v53 = vrot.slane %v1725_v33, %v1672_v8  ;;  %v178_v54 = vrot.slane %v1735_v38, %v1669_v7 }
  0x1f   :  { %v182_v55 = vrot.slane %v1735_v38, %v1672_v8  ;;  %v186_v56 = vrot.slane %v1737_v39, %v1669_v7  ;;  %v190_v57 = vrot.slane %v1737_v39, %v1672_v8  ;;  %v194_v58 = vrot.slane %v1747_v44, %v1669_v7 }
  0x20   :  { %v198_v59 = vrot.slane %v1747_v44, %v1672_v8  ;;  %v1780_v60 = vrot.slane %v74_v19, %v1669_v7  ;;  %v1783_v61 = vrot.slane %v78_v22, %v1669_v7  ;;  %v1786_v62 = vrot.slane %v82_v23, %v1669_v7 }
  0x21   :  { %v1789_v63 = vrot.slane %v86_v24, %v1669_v7  ;;  %v1792_v0 = vrot.slane %v90_v25, %v1669_v7  ;;  %v1795_v1 = vrot.slane %v94_v28, %v1669_v7  ;;  %v1798_v2 = vrot.slane %v98_v29, %v1669_v7 }
  0x22   :  { %v1801_v3 = vrot.slane %v102_v30, %v1669_v7  ;;  %v1804_v4 = vrot.slane %v106_v31, %v1669_v7  ;;  %v1807_v5 = vrot.slane %v110_v34, %v1669_v7  ;;  %v1810_v8 = vrot.slane %v114_v35, %v1669_v7 }
  0x23   :  { %2565 = vst [vmem:[#allocation8_spill] sm:$0xff] %v1798_v2  ;;  %v1813_v19 = vrot.slane %v118_v36, %v1669_v7  ;;  %v1816_v22 = vrot.slane %v122_v37, %v1669_v7  ;;  %v1819_v23 = vrot.slane %v126_v40, %v1669_v7  ;;  %v1822_v24 = vrot.slane %v130_v41, %v1669_v7 }
  0x24   :  { %2566 = vst [vmem:[#allocation9_spill] sm:$0xff] %v1801_v3  ;;  %2567 = vst [vmem:[#allocation10_spill] sm:$0xff] %v1804_v4  ;;  %v1825_v25 = vrot.slane %v134_v42, %v1669_v7  ;;  %v1828_v28 = vrot.slane %v138_v43, %v1669_v7  ;;  %v1831_v29 = vrot.slane %v142_v45, %v1669_v7 }
  0x25   :  { %2568 = vst [vmem:[#allocation11_spill] sm:$0xff] %v1807_v5  ;;  %2569 = vst [vmem:[#allocation12_spill] sm:$0xff] %v1810_v8  ;;  %v1834_v30 = vrot.slane %v146_v46, %v1669_v7  ;;  %v1837_v31 = vrot.slane %v150_v47, %v1669_v7  ;;  %v1840_v34 = vrot.slane %v154_v48, %v1669_v7 }
  0x26   :  { %2570 = vst [vmem:[#allocation13_spill] sm:$0xff] %v1813_v19  ;;  %2571 = vst [vmem:[#allocation14_spill] sm:$0xff] %v1816_v22  ;;  %v1843_v35 = vrot.slane %v158_v49, %v1669_v7  ;;  %v1846_v36 = vrot.slane %v162_v50, %v1669_v7  ;;  %v1849_v37 = vrot.slane %v166_v51, %v1669_v7 }
  0x27   :  { %2572 = vst [vmem:[#allocation15_spill] sm:$0xff] %v1819_v23  ;;  %2573 = vst [vmem:[#allocation16_spill] sm:$0xff] %v1822_v24  ;;  %v1852_v40 = vrot.slane %v170_v52, %v1669_v7  ;;  %v1855_v41 = vrot.slane %v174_v53, %v1669_v7  ;;  %v1858_v42 = vrot.slane %v178_v54, %v1669_v7 }
  0x28   :  { %2574 = vst [vmem:[#allocation17_spill] sm:$0xff] %v1825_v25  ;;  %2575 = vst [vmem:[#allocation18_spill] sm:$0xff] %v1828_v28  ;;  %v1861_v43 = vrot.slane %v182_v55, %v1669_v7  ;;  %v1864_v45 = vrot.slane %v186_v56, %v1669_v7  ;;  %v1867_v46 = vrot.slane %v190_v57, %v1669_v7 }
  0x29   :  { %2576 = vst [vmem:[#allocation19_spill] sm:$0xff] %v1831_v29  ;;  %2577 = vst [vmem:[#allocation20_spill] sm:$0xff] %v1834_v30  ;;  %v1870_v47 = vrot.slane %v194_v58, %v1669_v7  ;;  %v1873_v48 = vrot.slane %v198_v59, %v1669_v7  ;;  %v430_v49 = vrot.slane %v1674_v9, %v1681_v12 }
  0x2a   :  { %2578 = vst [vmem:[#allocation21_spill] sm:$0xff] %v1837_v31  ;;  %2579 = vst [vmem:[#allocation22_spill] sm:$0xff] %v1840_v34  ;;  %v434_v50 = vrot.slane %v1674_v9, %v1688_v15  ;;  %v438_v51 = vrot.slane %v1676_v10, %v1681_v12  ;;  %v442_v52 = vrot.slane %v1676_v10, %v1688_v15 }
  0x2b   :  { %2580 = vst [vmem:[#allocation23_spill] sm:$0xff] %v1843_v35  ;;  %2581 = vst [vmem:[#allocation24_spill] sm:$0xff] %v1846_v36  ;;  %v446_v53 = vrot.slane %v1678_v11, %v1681_v12  ;;  %v450_v54 = vrot.slane %v1678_v11, %v1688_v15  ;;  %v454_v7 = vrot.slane %v1683_v13, %v1681_v12 }
  0x2c   :  { %2582 = vst [vmem:[#allocation25_spill] sm:$0xff] %v1849_v37  ;;  %2583 = vst [vmem:[#allocation26_spill] sm:$0xff] %v1852_v40  ;;  %v458_v55 = vrot.slane %v1683_v13, %v1688_v15  ;;  %v462_v56 = vrot.slane %v1685_v14, %v1681_v12  ;;  %v466_v57 = vrot.slane %v1685_v14, %v1688_v15 }
  0x2d   :  { %2584 = vst [vmem:[#allocation27_spill] sm:$0xff] %v1855_v41  ;;  %2585 = vst [vmem:[#allocation28_spill] sm:$0xff] %v1858_v42  ;;  %v470_v58 = vrot.slane %v1693_v17, %v1681_v12  ;;  %v474_v59 = vrot.slane %v1693_v17, %v1688_v15  ;;  %v498_v42 = vrot.slane %v1701_v21, %v1688_v15 }
  0x2e   :  { %2586 = vst [vmem:[#allocation29_spill] sm:$0xff] %v1861_v43  ;;  %2587 = vst [vmem:[#allocation30_spill] sm:$0xff] %v1864_v45  ;;  %v490_v45 = vrot.slane %v1699_v20, %v1688_v15  ;;  %v494_v43 = vrot.slane %v1701_v21, %v1681_v12  ;;  %v502_v41 = vrot.slane %v1711_v26, %v1681_v12 }
  0x2f   :  { %2588 = vst [vmem:[#allocation31_spill] sm:$0xff] %v1867_v46  ;;  %2589 = vst [vmem:[#allocation32_spill] sm:$0xff] %v1870_v47  ;;  %v482_v47 = vrot.slane %v1695_v18, %v1688_v15  ;;  %v486_v46 = vrot.slane %v1699_v20, %v1681_v12  ;;  %v506_v40 = vrot.slane %v1711_v26, %v1688_v15 }
  0x30   :  { %2590 = vst [vmem:[#allocation33_spill] sm:$0xff] %v1873_v48  ;;  %v478_v48 = vrot.slane %v1695_v18, %v1681_v12  ;;  %v510_v37 = vrot.slane %v1713_v27, %v1681_v12  ;;  %v514_v36 = vrot.slane %v1713_v27, %v1688_v15  ;;  %v518_v35 = vrot.slane %v1723_v32, %v1681_v12 }
  0x31   :  { %v522_v34 = vrot.slane %v1723_v32, %v1688_v15  ;;  %v526_v31 = vrot.slane %v1725_v33, %v1681_v12  ;;  %v530_v30 = vrot.slane %v1725_v33, %v1688_v15  ;;  %v534_v29 = vrot.slane %v1735_v38, %v1681_v12 }
  0x32   :  { %v538_v28 = vrot.slane %v1735_v38, %v1688_v15  ;;  %v542_v25 = vrot.slane %v1737_v39, %v1681_v12  ;;  %v546_v24 = vrot.slane %v1737_v39, %v1688_v15  ;;  %v550_v23 = vrot.slane %v1747_v44, %v1681_v12 }
  0x33   :  { %v554_v22 = vrot.slane %v1747_v44, %v1688_v15  ;;  %v1940_v19 = vrot.slane %v430_v49, %v1681_v12  ;;  %v1943_v8 = vrot.slane %v434_v50, %v1681_v12  ;;  %v1946_v5 = vrot.slane %v438_v51, %v1681_v12 }
  0x34   :  { %v1949_v4 = vrot.slane %v442_v52, %v1681_v12  ;;  %v1952_v3 = vrot.slane %v446_v53, %v1681_v12  ;;  %v1955_v2 = vrot.slane %v450_v54, %v1681_v12  ;;  %v1958_v15 = vrot.slane %v454_v7, %v1681_v12 }
  0x35   :  { %v1961_v49 = vrot.slane %v458_v55, %v1681_v12  ;;  %v1964_v50 = vrot.slane %v462_v56, %v1681_v12  ;;  %v1967_v51 = vrot.slane %v466_v57, %v1681_v12  ;;  %v1970_v52 = vrot.slane %v470_v58, %v1681_v12 }
  0x36   :  { %v1973_v53 = vrot.slane %v474_v59, %v1681_v12  ;;  %v1976_v54 = vrot.slane %v478_v48, %v1681_v12  ;;  %v1979_v7 = vrot.slane %v482_v47, %v1681_v12  ;;  %v1982_v55 = vrot.slane %v486_v46, %v1681_v12 }
  0x37   :  { %v1985_v56 = vrot.slane %v490_v45, %v1681_v12  ;;  %v1988_v57 = vrot.slane %v494_v43, %v1681_v12  ;;  %v1991_v58 = vrot.slane %v498_v42, %v1681_v12  ;;  %v1994_v59 = vrot.slane %v502_v41, %v1681_v12 }
  0x38   :  { %v1997_v48 = vrot.slane %v506_v40, %v1681_v12  ;;  %v2000_v47 = vrot.slane %v510_v37, %v1681_v12  ;;  %v2003_v46 = vrot.slane %v514_v36, %v1681_v12  ;;  %v2006_v45 = vrot.slane %v518_v35, %v1681_v12 }
  0x39   :  { %2591 = vst [vmem:[#allocation34_spill] sm:$0xff] %v1991_v58  ;;  %2592 = vst [vmem:[#allocation35_spill] sm:$0xff] %v1994_v59  ;;  %v2009_v43 = vrot.slane %v522_v34, %v1681_v12  ;;  %v2012_v42 = vsub.s32 6, %v1666_v6  ;;  %v2015_v41 = vrot.slane %v526_v31, %v1681_v12  ;;  %v2018_v40 = vrot.slane %v530_v30, %v1681_v12 }
  0x3a   :  { %2593 = vst [vmem:[#allocation36_spill] sm:$0xff] %v1997_v48  ;;  %2594 = vst [vmem:[#allocation37_spill] sm:$0xff] %v2000_v47  ;;  %v2021_v37 = vrot.slane %v534_v29, %v1681_v12  ;;  %v2024_v36 = vrot.slane %v538_v28, %v1681_v12  ;;  %v2027_v35 = vrot.slane %v542_v25, %v1681_v12 }
  0x3b   :  { %2595 = vst [vmem:[#allocation38_spill] sm:$0xff] %v2003_v46  ;;  %2596 = vst [vmem:[#allocation39_spill] sm:$0xff] %v2006_v45  ;;  %v2030_v34 = vrot.slane %v546_v24, %v1681_v12  ;;  %v2033_v6 = vrot.slane %v550_v23, %v1681_v12  ;;  %v2036_v31 = vrot.slane %v554_v22, %v1681_v12 }
  0x3c   :  { %2597 = vst [vmem:[#allocation40_spill] sm:$0xff] %v2009_v43  ;;  %2598 = vst [vmem:[#allocation41_spill] sm:$0xff] %v2015_v41  ;;  %v786_v30 = vrot.slane %v1674_v9, %v1691_v16  ;;  %v794_v29 = vrot.slane %v1676_v10, %v1691_v16  ;;  %v802_v28 = vrot.slane %v1678_v11, %v1691_v16 }
  0x3d   :  { %2599 = vst [vmem:[#allocation42_spill] sm:$0xff] %v2018_v40  ;;  %2600 = vst [vmem:[#allocation43_spill] sm:$0xff] %v2021_v37  ;;  %v810_v25 = vrot.slane %v1683_v13, %v1691_v16  ;;  %v790_v24 = vrot.slane %v1674_v9, %v2012_v42  ;;  %v798_v23 = vrot.slane %v1676_v10, %v2012_v42 }
  0x3e   :  { %2601 = vst [vmem:[#allocation44_spill] sm:$0xff] %v2024_v36  ;;  %2602 = vst [vmem:[#allocation45_spill] sm:$0xff] %v2027_v35  ;;  %v806_v12 = vrot.slane %v1678_v11, %v2012_v42  ;;  %v814_v22 = vrot.slane %v1683_v13, %v2012_v42  ;;  %v830_v9 = vrot.slane %v1693_v17, %v2012_v42 }
  0x3f   :  { %2603 = vst [vmem:[#allocation46_spill] sm:$0xff] %v2030_v34  ;;  %2604 = vst [vmem:[#allocation47_spill] sm:$0xff] %v2033_v6  ;;  %v822_v6 = vrot.slane %v1685_v14, %v2012_v42  ;;  %v826_v34 = vrot.slane %v1693_v17, %v1691_v16  ;;  %v834_v10 = vrot.slane %v1695_v18, %v1691_v16 }
  0x40   :  { %2605 = vst [vmem:[#allocation48_spill] sm:$0xff] %v2036_v31  ;;  %v818_v31 = vrot.slane %v1685_v14, %v1691_v16  ;;  %v838_v11 = vrot.slane %v1695_v18, %v2012_v42  ;;  %v842_v13 = vrot.slane %v1699_v20, %v1691_v16  ;;  %v846_v35 = vrot.slane %v1699_v20, %v2012_v42 }
  0x41   :  { %v850_v14 = vrot.slane %v1701_v21, %v1691_v16  ;;  %v854_v36 = vrot.slane %v1701_v21, %v2012_v42  ;;  %v858_v17 = vrot.slane %v1711_v26, %v1691_v16  ;;  %v862_v37 = vrot.slane %v1711_v26, %v2012_v42 }
  0x42   :  { %v866_v18 = vrot.slane %v1713_v27, %v1691_v16  ;;  %v870_v40 = vrot.slane %v1713_v27, %v2012_v42  ;;  %v874_v20 = vrot.slane %v1723_v32, %v1691_v16  ;;  %v878_v41 = vrot.slane %v1723_v32, %v2012_v42 }
  0x43   :  { %v882_v21 = vrot.slane %v1725_v33, %v1691_v16  ;;  %v886_v43 = vrot.slane %v1725_v33, %v2012_v42  ;;  %v890_v26 = vrot.slane %v1735_v38, %v1691_v16  ;;  %v894_v45 = vrot.slane %v1735_v38, %v2012_v42 }
  0x44   :  { %v898_v27 = vrot.slane %v1737_v39, %v1691_v16  ;;  %v902_v46 = vrot.slane %v1737_v39, %v2012_v42  ;;  %v906_v32 = vrot.slane %v1747_v44, %v1691_v16  ;;  %v910_v47 = vrot.slane %v1747_v44, %v2012_v42 }
  0x45   :  { %v2103_v33 = vrot.slane %v786_v30, %v1691_v16  ;;  %v2106_v48 = vrot.slane %v790_v24, %v1691_v16  ;;  %v2109_v38 = vrot.slane %v794_v29, %v1691_v16  ;;  %v2112_v59 = vrot.slane %v798_v23, %v1691_v16 }
  0x46   :  { %v2115_v39 = vrot.slane %v802_v28, %v1691_v16  ;;  %v2118_v58 = vrot.slane %v806_v12, %v1691_v16  ;;  %v2121_v44 = vrot.slane %v810_v25, %v1691_v16  ;;  %v2124_v42 = vrot.slane %v814_v22, %v1691_v16 }
  0x47   :  { %2606 = vst [vmem:[#allocation49_spill] sm:$0xff] %v2103_v33  ;;  %2607 = vst [vmem:[#allocation50_spill] sm:$0xff] %v2106_v48  ;;  %v2127_v30 = vrot.slane %v818_v31, %v1691_v16  ;;  %v2130_v29 = vrot.slane %v822_v6, %v1691_v16  ;;  %v2133_v24 = vrot.slane %v826_v34, %v1691_v16  ;;  %v2677_v48 = vld [vmem:[#allocation36_spill] sm:$0xff]  ;;  %v2678_v33 = vld [vmem:[#allocation37_spill] sm:$0xff] }
  0x48   :  { %2608 = vst [vmem:[#allocation51_spill] sm:$0xff] %v2109_v38  ;;  %2609 = vst [vmem:[#allocation52_spill] sm:$0xff] %v2112_v59  ;;  %v2136_v28 = vrot.slane %v830_v9, %v1691_v16  ;;  %v2139_v23 = vrot.slane %v834_v10, %v1691_v16  ;;  %v2142_v25 = vrot.slane %v838_v11, %v1691_v16  ;;  %v2663_v59 = vld [vmem:[#allocation33_spill] sm:$0xff] }
  0x49   :  { %2610 = vst [vmem:[#allocation53_spill] sm:$0xff] %v2115_v39  ;;  %2611 = vst [vmem:[#allocation54_spill] sm:$0xff] %v2118_v58  ;;  %v2145_v12 = vrot.slane %v842_v13, %v1691_v16  ;;  %v2148_v31 = vrot.slane %v846_v35, %v1691_v16  ;;  %v2151_v6 = vrot.slane %v850_v14, %v1691_v16  ;;  %v2662_v39 = vld [vmem:[#allocation32_spill] sm:$0xff] }
  0x4a   :  { %2612 = vst [vmem:[#allocation55_spill] sm:$0xff] %v2121_v44  ;;  %2613 = vst [vmem:[#allocation56_spill] sm:$0xff] %v2124_v42  ;;  %v2154_v34 = vrot.slane %v854_v36, %v1691_v16  ;;  %v2157_v22 = vrot.slane %v858_v17, %v1691_v16  ;;  %v2160_v9 = vrot.slane %v862_v37, %v1691_v16 }
  0x4b   :  { %2614 = vst [vmem:[#allocation57_spill] sm:$0xff] %v2127_v30  ;;  %2615 = vst [vmem:[#allocation58_spill] sm:$0xff] %v2130_v29  ;;  %v2163_v11 = vrot.slane %v866_v18, %v1691_v16  ;;  %v2166_v13 = vrot.slane %v870_v40, %v1691_v16  ;;  %v2169_v35 = vrot.slane %v874_v20, %v1691_v16 }
  0x4c   :  { %2616 = vst [vmem:[#allocation59_spill] sm:$0xff] %v2133_v24  ;;  %2617 = vst [vmem:[#allocation60_spill] sm:$0xff] %v2136_v28  ;;  %v2172_v14 = vrot.slane %v878_v41, %v1691_v16  ;;  %v2175_v36 = vrot.slane %v882_v21, %v1691_v16  ;;  %v2178_v17 = vrot.slane %v886_v43, %v1691_v16 }
  0x4d   :  { %2618 = vst [vmem:[#allocation61_spill] sm:$0xff] %v2139_v23  ;;  %2619 = vst [vmem:[#allocation62_spill] sm:$0xff] %v2142_v25  ;;  %v2181_v37 = vrot.slane %v890_v26, %v1691_v16  ;;  %v2184_v18 = vrot.slane %v894_v45, %v1691_v16  ;;  %v2187_v40 = vrot.slane %v898_v27, %v1691_v16 }
  0x4e   :  { %2620 = vst [vmem:[#allocation63_spill] sm:$0xff] %v2145_v12  ;;  %2621 = vst [vmem:[#allocation64_spill] sm:$0xff] %v2148_v31  ;;  %v2190_v20 = vrot.slane %v902_v46, %v1691_v16  ;;  %v2193_v41 = vrot.slane %v906_v32, %v1691_v16  ;;  %v2196_v21 = vrot.slane %v910_v47, %v1691_v16  ;;  %v2638_v46 = vld [vmem:[#allocation8_spill] sm:$0xff]  ;;  %v2641_v16 = vld [vmem:[#allocation11_spill] sm:$0xff] }
  0x4f   :  { %2622 = vst [vmem:[#allocation65_spill] sm:$0xff] %v2151_v6  ;;  %2623 = vst [vmem:[#allocation66_spill] sm:$0xff] %v2154_v34  ;;  %v2650_v34 = vld [vmem:[#allocation20_spill] sm:$0xff]  ;;  %v2651_v6 = vld [vmem:[#allocation21_spill] sm:$0xff] }
  0x50   :  { %2624 = vst [vmem:[#allocation67_spill] sm:$0xff] %v2157_v22  ;;  %2625 = vst [vmem:[#allocation68_spill] sm:$0xff] %v2160_v9  ;;  %v2648_v9 = vld [vmem:[#allocation18_spill] sm:$0xff]  ;;  %v2649_v22 = vld [vmem:[#allocation19_spill] sm:$0xff] }
  0x51   :  { %2626 = vst [vmem:[#allocation69_spill] sm:$0xff] %v2163_v11  ;;  %2627 = vst [vmem:[#allocation70_spill] sm:$0xff] %v2166_v13  ;;  %v2646_v13 = vld [vmem:[#allocation16_spill] sm:$0xff]  ;;  %v2647_v11 = vld [vmem:[#allocation17_spill] sm:$0xff] }
  0x52   :  { %2628 = vst [vmem:[#allocation71_spill] sm:$0xff] %v2169_v35  ;;  %2629 = vst [vmem:[#allocation72_spill] sm:$0xff] %v2172_v14  ;;  %v2644_v14 = vld [vmem:[#allocation14_spill] sm:$0xff]  ;;  %v2645_v35 = vld [vmem:[#allocation15_spill] sm:$0xff] }
  0x53   :  { %2630 = vst [vmem:[#allocation73_spill] sm:$0xff] %v2175_v36  ;;  %2631 = vst [vmem:[#allocation74_spill] sm:$0xff] %v2178_v17  ;;  %v2643_v36 = vld [vmem:[#allocation13_spill] sm:$0xff] }
  0x54   :  { %2632 = vst [vmem:[#allocation75_spill] sm:$0xff] %v2181_v37  ;;  %2633 = vst [vmem:[#allocation76_spill] sm:$0xff] %v2184_v18  ;;  %v2639_v18 = vld [vmem:[#allocation9_spill] sm:$0xff] }
  0x55   :  { %2634 = vst [vmem:[#allocation77_spill] sm:$0xff] %v2187_v40  ;;  %2635 = vst [vmem:[#allocation78_spill] sm:$0xff] %v2190_v20 }
  0x56   :  { %2636 = vst [vmem:[#allocation79_spill] sm:$0xff] %v2193_v41  ;;  %2637 = vst [vmem:[#allocation80_spill] sm:$0xff] %v2196_v21  ;;  %v2640_v41 = vld [vmem:[#allocation10_spill] sm:$0xff]  ;;  %v2642_v21 = vld [vmem:[#allocation12_spill] sm:$0xff] }
  0x93   :  { %v53_v10 = vpop.permute.xlu0 %52 }
  0x94   :  { %v359_v43 = vmul.f32 %v1780_v60, %v53_v10  ;;  %v360_v26 = vmul.f32 %v1783_v61, %v53_v10  ;;  %v361_v37 = vmul.f32 %v1786_v62, %v53_v10  ;;  %v362_v45 = vmul.f32 %v1789_v63, %v53_v10 }
  0x95   :  { %v363_v27 = vmul.f32 %v1792_v0, %v53_v10  ;;  %v364_v40 = vmul.f32 %v1795_v1, %v53_v10  ;;  %v365_v20 = vmul.f32 %v2638_v46, %v53_v10  ;;  %v366_v32 = vmul.f32 %v2639_v18, %v53_v10 }
  0x96   :  { %v367_v17 = vmul.f32 %v2640_v41, %v53_v10  ;;  %v368_v47 = vmul.f32 %v2641_v16, %v53_v10  ;;  %v369_v60 = vmul.f32 %v2642_v21, %v53_v10  ;;  %v370_v61 = vmul.f32 %v2643_v36, %v53_v10  ;;  %v2652_v21 = vld [vmem:[#allocation22_spill] sm:$0xff]  ;;  %v2653_v36 = vld [vmem:[#allocation23_spill] sm:$0xff] }
  0x97   :  { %v371_v62 = vmul.f32 %v2644_v14, %v53_v10  ;;  %v372_v63 = vmul.f32 %v2645_v35, %v53_v10  ;;  %v373_v0 = vmul.f32 %v2646_v13, %v53_v10  ;;  %v374_v1 = vmul.f32 %v2647_v11, %v53_v10  ;;  %v48_v31 = vpop.permute.xlu0 %47  ;;  %v2654_v14 = vld [vmem:[#allocation24_spill] sm:$0xff]  ;;  %v2655_v35 = vld [vmem:[#allocation25_spill] sm:$0xff]  ;;  %v2656_v13 = vld [vmem:[#allocation26_spill] sm:$0xff] }
  0x98   :  { %v375_v46 = vmul.f32 %v2648_v9, %v53_v10  ;;  %v376_v18 = vmul.f32 %v2649_v22, %v53_v10  ;;  %v377_v41 = vmul.f32 %v2650_v34, %v53_v10  ;;  %v378_v16 = vmul.f32 %v2651_v6, %v53_v10  ;;  %v2657_v11 = vld [vmem:[#allocation27_spill] sm:$0xff]  ;;  %v2658_v9 = vld [vmem:[#allocation28_spill] sm:$0xff]  ;;  %v2659_v22 = vld [vmem:[#allocation29_spill] sm:$0xff] }
  0x99   :  { %v379_v12 = vmul.f32 %v2652_v21, %v53_v10  ;;  %v380_v25 = vmul.f32 %v2653_v36, %v53_v10  ;;  %v381_v23 = vmul.f32 %v2654_v14, %v53_v10  ;;  %v382_v28 = vmul.f32 %v2655_v35, %v53_v10  ;;  %v2660_v34 = vld [vmem:[#allocation30_spill] sm:$0xff]  ;;  %v2661_v6 = vld [vmem:[#allocation31_spill] sm:$0xff] }
  0x9a   :  { %v383_v24 = vmul.f32 %v2656_v13, %v53_v10  ;;  %v384_v29 = vmul.f32 %v2657_v11, %v53_v10  ;;  %v385_v30 = vmul.f32 %v2658_v9, %v53_v10  ;;  %v386_v42 = vmul.f32 %v2659_v22, %v53_v10 }
  0x9b   :  { %v387_v44 = vmul.f32 %v2660_v34, %v53_v10  ;;  %v388_v58 = vmul.f32 %v2661_v6, %v53_v10  ;;  %v389_v21 = vmul.f32 %v2662_v39, %v53_v10  ;;  %v390_v36 = vmul.f32 %v2663_v59, %v53_v10 }
  0x9c   :  { %v2230_v38 = vadd.f32 %v359_v43, %v48_v31  ;;  %v2232_v14 = vadd.f32 %v360_v26, %v48_v31  ;;  %v2234_v35 = vadd.f32 %v361_v37, %v48_v31  ;;  %v2236_v13 = vadd.f32 %v362_v45, %v48_v31 }
  0x9d   :  { %v2238_v11 = vadd.f32 %v363_v27, %v48_v31  ;;  %v2240_v9 = vadd.f32 %v364_v40, %v48_v31  ;;  %v2242_v22 = vadd.f32 %v365_v20, %v48_v31  ;;  %v2244_v34 = vadd.f32 %v366_v32, %v48_v31  ;;  %v425_v32 = vpop.permute.xlu1 %424 }
  0x9e   :  { %v2246_v6 = vadd.f32 %v367_v17, %v48_v31  ;;  %v2248_v39 = vadd.f32 %v368_v47, %v48_v31  ;;  %v2250_v59 = vadd.f32 %v369_v60, %v48_v31  ;;  %v2252_v10 = vadd.f32 %v370_v61, %v48_v31 }
  0x9f   :  { %v2254_v37 = vadd.f32 %v371_v62, %v48_v31  ;;  %v2256_v43 = vadd.f32 %v372_v63, %v48_v31  ;;  %v2258_v26 = vadd.f32 %v373_v0, %v48_v31  ;;  %v2260_v40 = vadd.f32 %v374_v1, %v48_v31 }
  0xa0   :  { %v2262_v20 = vadd.f32 %v375_v46, %v48_v31  ;;  %v2264_v45 = vadd.f32 %v376_v18, %v48_v31  ;;  %v2266_v17 = vadd.f32 %v377_v41, %v48_v31  ;;  %v2268_v27 = vadd.f32 %v378_v16, %v48_v31 }
  0xa1   :  { %v2270_v47 = vadd.f32 %v379_v12, %v48_v31  ;;  %v2272_v60 = vadd.f32 %v380_v25, %v48_v31  ;;  %v2274_v61 = vadd.f32 %v381_v23, %v48_v31  ;;  %v2276_v62 = vadd.f32 %v382_v28, %v48_v31 }
  0xa2   :  { %v2278_v63 = vadd.f32 %v383_v24, %v48_v31  ;;  %v2280_v0 = vadd.f32 %v384_v29, %v48_v31  ;;  %v2282_v1 = vadd.f32 %v385_v30, %v48_v31  ;;  %v2284_v46 = vadd.f32 %v386_v42, %v48_v31 }
  0xa3   :  { %2664 = vst [vmem:[#allocation8_spill] sm:$0xff] %v2272_v60  ;;  %2665 = vst [vmem:[#allocation9_spill] sm:$0xff] %v2274_v61  ;;  %v2286_v18 = vadd.f32 %v387_v44, %v48_v31  ;;  %v2288_v41 = vadd.f32 %v388_v58, %v48_v31  ;;  %v2290_v12 = vadd.f32 %v389_v21, %v48_v31  ;;  %v2675_v21 = vld [vmem:[#allocation34_spill] sm:$0xff]  ;;  %v2688_v61 = vld [vmem:[#allocation47_spill] sm:$0xff] }
  0xa4   :  { %2666 = vst [vmem:[#allocation10_spill] sm:$0xff] %v2276_v62  ;;  %2667 = vst [vmem:[#allocation11_spill] sm:$0xff] %v2278_v63  ;;  %v2292_v25 = vadd.f32 %v390_v36, %v48_v31  ;;  %v715_v23 = vmul.f32 %v1940_v19, %v425_v32  ;;  %v716_v28 = vmul.f32 %v1943_v8, %v425_v32  ;;  %v2676_v36 = vld [vmem:[#allocation35_spill] sm:$0xff]  ;;  %v2686_v63 = vld [vmem:[#allocation45_spill] sm:$0xff] }
  0xa5   :  { %2668 = vst [vmem:[#allocation12_spill] sm:$0xff] %v2280_v0  ;;  %2669 = vst [vmem:[#allocation13_spill] sm:$0xff] %v2282_v1  ;;  %v717_v24 = vmul.f32 %v1946_v5, %v425_v32  ;;  %v718_v29 = vmul.f32 %v1949_v4, %v425_v32  ;;  %v719_v30 = vmul.f32 %v1952_v3, %v425_v32  ;;  %v2684_v1 = vld [vmem:[#allocation43_spill] sm:$0xff]  ;;  %v2685_v0 = vld [vmem:[#allocation44_spill] sm:$0xff] }
  0xa6   :  { %2670 = vst [vmem:[#allocation14_spill] sm:$0xff] %v2284_v46  ;;  %2671 = vst [vmem:[#allocation15_spill] sm:$0xff] %v2286_v18  ;;  %v720_v42 = vmul.f32 %v1955_v2, %v425_v32  ;;  %v721_v44 = vmul.f32 %v1958_v15, %v425_v32  ;;  %v722_v58 = vmul.f32 %v1961_v49, %v425_v32  ;;  %v2682_v18 = vld [vmem:[#allocation41_spill] sm:$0xff]  ;;  %v2683_v46 = vld [vmem:[#allocation42_spill] sm:$0xff] }
  0xa7   :  { %2672 = vst [vmem:[#allocation16_spill] sm:$0xff] %v2288_v41  ;;  %2673 = vst [vmem:[#allocation17_spill] sm:$0xff] %v2290_v12  ;;  %v723_v16 = vmul.f32 %v1964_v50, %v425_v32  ;;  %v724_v31 = vmul.f32 %v1967_v51, %v425_v32  ;;  %v725_v19 = vmul.f32 %v1970_v52, %v425_v32  ;;  %v2680_v12 = vld [vmem:[#allocation39_spill] sm:$0xff]  ;;  %v2681_v41 = vld [vmem:[#allocation40_spill] sm:$0xff] }
  0xa8   :  { %2674 = vst [vmem:[#allocation18_spill] sm:$0xff] %v2292_v25  ;;  %v726_v8 = vmul.f32 %v1973_v53, %v425_v32  ;;  %v727_v5 = vmul.f32 %v1976_v54, %v425_v32  ;;  %v728_v4 = vmul.f32 %v1979_v7, %v425_v32  ;;  %v729_v3 = vmul.f32 %v1982_v55, %v425_v32  ;;  %v2679_v25 = vld [vmem:[#allocation38_spill] sm:$0xff]  ;;  %v2689_v60 = vld [vmem:[#allocation48_spill] sm:$0xff] }
  0xa9   :  { %v730_v2 = vmul.f32 %v1985_v56, %v425_v32  ;;  %v731_v15 = vmul.f32 %v1988_v57, %v425_v32  ;;  %v732_v49 = vmul.f32 %v2675_v21, %v425_v32  ;;  %v733_v50 = vmul.f32 %v2676_v36, %v425_v32  ;;  %v2687_v62 = vld [vmem:[#allocation46_spill] sm:$0xff] }
  0xaa   :  { %v734_v51 = vmul.f32 %v2677_v48, %v425_v32  ;;  %v735_v52 = vmul.f32 %v2678_v33, %v425_v32  ;;  %v736_v53 = vmul.f32 %v2679_v25, %v425_v32  ;;  %v737_v54 = vmul.f32 %v2680_v12, %v425_v32 }
  0xab   :  { %v738_v7 = vmul.f32 %v2681_v41, %v425_v32  ;;  %v739_v55 = vmul.f32 %v2682_v18, %v425_v32  ;;  %v740_v56 = vmul.f32 %v2683_v46, %v425_v32  ;;  %v741_v57 = vmul.f32 %v2684_v1, %v425_v32 }
  0xac   :  { %v742_v21 = vmul.f32 %v2685_v0, %v425_v32  ;;  %v743_v36 = vmul.f32 %v2686_v63, %v425_v32  ;;  %v744_v48 = vmul.f32 %v2687_v62, %v425_v32  ;;  %v745_v33 = vmul.f32 %v2688_v61, %v425_v32 }
  0xad   :  { %v746_v25 = vmul.f32 %v2689_v60, %v425_v32  ;;  %v747_v12 = vadd.f32 %v715_v23, %v2230_v38  ;;  %v748_v41 = vadd.f32 %v716_v28, %v2232_v14  ;;  %v749_v18 = vadd.f32 %v717_v24, %v2234_v35  ;;  %v2693_v60 = vld [vmem:[#allocation11_spill] sm:$0xff] }
  0xae   :  { %v750_v46 = vadd.f32 %v718_v29, %v2236_v13  ;;  %v751_v1 = vadd.f32 %v719_v30, %v2238_v11  ;;  %v752_v0 = vadd.f32 %v720_v42, %v2240_v9  ;;  %v753_v63 = vadd.f32 %v721_v44, %v2242_v22  ;;  %v2697_v30 = vld [vmem:[#allocation15_spill] sm:$0xff]  ;;  %v2699_v44 = vld [vmem:[#allocation16_spill] sm:$0xff] }
  0xaf   :  { %v2334_v62 = vadd.f32 %v722_v58, %v2244_v34  ;;  %v2337_v61 = vadd.f32 %v723_v16, %v2246_v6  ;;  %v2340_v38 = vadd.f32 %v724_v31, %v2248_v39  ;;  %v2343_v14 = vadd.f32 %v725_v19, %v2250_v59  ;;  %v2701_v16 = vld [vmem:[#allocation17_spill] sm:$0xff]  ;;  %v2703_v19 = vld [vmem:[#allocation18_spill] sm:$0xff] }
  0xb0   :  { %v2346_v35 = vadd.f32 %v726_v8, %v2252_v10  ;;  %v2349_v13 = vadd.f32 %v727_v5, %v2254_v37  ;;  %v2352_v11 = vadd.f32 %v728_v4, %v2256_v43  ;;  %v2355_v9 = vadd.f32 %v729_v3, %v2258_v26  ;;  %v2690_v37 = vld [vmem:[#allocation8_spill] sm:$0xff]  ;;  %v2691_v26 = vld [vmem:[#allocation9_spill] sm:$0xff]  ;;  %v2706_v3 = vld [vmem:[#allocation50_spill] sm:$0xff] }
  0xb1   :  { %v2358_v22 = vadd.f32 %v730_v2, %v2260_v40  ;;  %v2361_v34 = vadd.f32 %v731_v15, %v2262_v20  ;;  %v2364_v6 = vadd.f32 %v732_v49, %v2264_v45  ;;  %v2367_v39 = vadd.f32 %v733_v50, %v2266_v17  ;;  %v2692_v20 = vld [vmem:[#allocation10_spill] sm:$0xff]  ;;  %v781_v45 = vpop.permute.xlu1 %780  ;;  %v2694_v17 = vld [vmem:[#allocation12_spill] sm:$0xff]  ;;  %v2705_v5 = vld [vmem:[#allocation49_spill] sm:$0xff] }
  0xb2   :  { %v2370_v59 = vadd.f32 %v734_v51, %v2268_v27  ;;  %v2373_v10 = vadd.f32 %v735_v52, %v2270_v47  ;;  %v2376_v43 = vadd.f32 %v736_v53, %v2690_v37  ;;  %v2379_v40 = vadd.f32 %v737_v54, %v2691_v26  ;;  %v2695_v27 = vld [vmem:[#allocation13_spill] sm:$0xff]  ;;  %v2696_v47 = vld [vmem:[#allocation14_spill] sm:$0xff]  ;;  %v2707_v15 = vld [vmem:[#allocation51_spill] sm:$0xff] }
  0xb3   :  { %v2382_v32 = vadd.f32 %v738_v7, %v2692_v20  ;;  %v2385_v23 = vadd.f32 %v739_v55, %v2693_v60  ;;  %v2388_v28 = vadd.f32 %v740_v56, %v2694_v17  ;;  %v2391_v24 = vadd.f32 %v741_v57, %v2695_v27  ;;  %v2708_v50 = vld [vmem:[#allocation52_spill] sm:$0xff]  ;;  %v2709_v52 = vld [vmem:[#allocation53_spill] sm:$0xff]  ;;  %v2710_v54 = vld [vmem:[#allocation54_spill] sm:$0xff] }
  0xb4   :  { %v2394_v29 = vadd.f32 %v742_v21, %v2696_v47  ;;  %v2397_v42 = vadd.f32 %v743_v36, %v2697_v30  ;;  %v2400_v58 = vadd.f32 %v744_v48, %v2699_v44  ;;  %v2403_v31 = vadd.f32 %v745_v33, %v2701_v16  ;;  %v2711_v55 = vld [vmem:[#allocation55_spill] sm:$0xff]  ;;  %v2712_v57 = vld [vmem:[#allocation56_spill] sm:$0xff]  ;;  %v2713_v36 = vld [vmem:[#allocation57_spill] sm:$0xff] }
  0xb5   :  { %v2406_v8 = vadd.f32 %v746_v25, %v2703_v19  ;;  %v1071_v4 = vmul.f32 %v2705_v5, %v781_v45  ;;  %v1072_v2 = vmul.f32 %v2706_v3, %v781_v45  ;;  %v1073_v49 = vmul.f32 %v2707_v15, %v781_v45  ;;  %v2714_v33 = vld [vmem:[#allocation58_spill] sm:$0xff]  ;;  %v2715_v37 = vld [vmem:[#allocation59_spill] sm:$0xff]  ;;  %v2716_v20 = vld [vmem:[#allocation60_spill] sm:$0xff] }
  0xb6   :  { %2698 = vst [vmem:[#allocation19_spill] sm:$0xff] %v2397_v42  ;;  %2700 = vst [vmem:[#allocation20_spill] sm:$0xff] %v2400_v58  ;;  %v1074_v51 = vmul.f32 %v2708_v50, %v781_v45  ;;  %v1075_v53 = vmul.f32 %v2709_v52, %v781_v45  ;;  %v1076_v7 = vmul.f32 %v2710_v54, %v781_v45  ;;  %v2717_v17 = vld [vmem:[#allocation61_spill] sm:$0xff]  ;;  %v2718_v47 = vld [vmem:[#allocation62_spill] sm:$0xff] }
  0xb7   :  { %2702 = vst [vmem:[#allocation21_spill] sm:$0xff] %v2403_v31  ;;  %2704 = vst [vmem:[#allocation22_spill] sm:$0xff] %v2406_v8  ;;  %v1077_v56 = vmul.f32 %v2711_v55, %v781_v45  ;;  %v1078_v21 = vmul.f32 %v2712_v57, %v781_v45  ;;  %v1079_v48 = vmul.f32 %v2713_v36, %v781_v45  ;;  %v2719_v44 = vld [vmem:[#allocation63_spill] sm:$0xff]  ;;  %v2720_v19 = vld [vmem:[#allocation64_spill] sm:$0xff] }
  0xb8   :  { %v1080_v25 = vmul.f32 %v2714_v33, %v781_v45  ;;  %v1081_v26 = vmul.f32 %v2715_v37, %v781_v45  ;;  %v1082_v60 = vmul.f32 %v2716_v20, %v781_v45  ;;  %v1083_v27 = vmul.f32 %v2717_v17, %v781_v45  ;;  %v2721_v3 = vld [vmem:[#allocation65_spill] sm:$0xff]  ;;  %v2722_v55 = vld [vmem:[#allocation66_spill] sm:$0xff]  ;;  %v2723_v36 = vld [vmem:[#allocation67_spill] sm:$0xff] }
  0xb9   :  { %v1084_v30 = vmul.f32 %v2718_v47, %v781_v45  ;;  %v1085_v16 = vmul.f32 %v2719_v44, %v781_v45  ;;  %v1086_v5 = vmul.f32 %v2720_v19, %v781_v45  ;;  %v1087_v15 = vmul.f32 %v2721_v3, %v781_v45  ;;  %v2724_v37 = vld [vmem:[#allocation68_spill] sm:$0xff]  ;;  %v2725_v31 = vld [vmem:[#allocation69_spill] sm:$0xff]  ;;  %v2726_v47 = vld [vmem:[#allocation70_spill] sm:$0xff] }
  0xba   :  { %v1103_v50 = vadd.f32 %v1071_v4, %v747_v12  ;;  %v1104_v52 = vadd.f32 %v1072_v2, %v748_v41  ;;  %v1105_v54 = vadd.f32 %v1073_v49, %v749_v18  ;;  %v1088_v57 = vmul.f32 %v2722_v55, %v781_v45  ;;  %v2727_v44 = vld [vmem:[#allocation71_spill] sm:$0xff]  ;;  %v2728_v12 = vld [vmem:[#allocation72_spill] sm:$0xff]  ;;  %v2729_v18 = vld [vmem:[#allocation73_spill] sm:$0xff] }
  0xbb   :  { %v1089_v33 = vmul.f32 %v2723_v36, %v781_v45  ;;  %v1090_v8 = vmul.f32 %v2724_v37, %v781_v45  ;;  %v1106_v20 = vadd.f32 %v1074_v51, %v750_v46  ;;  %v2429_v17 = vmul.f32 %v2725_v31, %v781_v45  ;;  %v2730_v55 = vld [vmem:[#allocation74_spill] sm:$0xff]  ;;  %v2731_v37 = vld [vmem:[#allocation75_spill] sm:$0xff] }
  0xbc   :  { %v2432_v58 = vmul.f32 %v2726_v47, %v781_v45  ;;  %v2435_v19 = vmul.f32 %v2727_v44, %v781_v45  ;;  %v1107_v3 = vadd.f32 %v1075_v53, %v751_v1  ;;  %v2438_v41 = vmul.f32 %v2728_v12, %v781_v45  ;;  %v2732_v44 = vld [vmem:[#allocation76_spill] sm:$0xff]  ;;  %v2733_v12 = vld [vmem:[#allocation77_spill] sm:$0xff] }
  0xbd   :  { %v2441_v4 = vmul.f32 %v2729_v18, %v781_v45  ;;  %v1108_v2 = vadd.f32 %v1076_v7, %v752_v0  ;;  %v1109_v49 = vadd.f32 %v1077_v56, %v753_v63  ;;  %v2444_v46 = vmul.f32 %v2730_v55, %v781_v45  ;;  %v2735_v0 = vld [vmem:[#allocation78_spill] sm:$0xff] }
  0xbe   :  { %v1135_v31 = vmax.f32 %v1103_v50, 0.0  ;;  %v1136_v51 = vmax.f32 %v1104_v52, 0.0  ;;  %v1137_v36 = vmax.f32 %v1105_v54, 0.0  ;;  %v2447_v47 = vmul.f32 %v2731_v37, %v781_v45  ;;  %v2737_v50 = vld [vmem:[#allocation79_spill] sm:$0xff] }
  0xbf   :  { %v2450_v42 = vmul.f32 %v2732_v44, %v781_v45  ;;  %v1110_v1 = vadd.f32 %v1078_v21, %v2334_v62  ;;  %v1138_v53 = vmax.f32 %v1106_v20, 0.0  ;;  %v2454_v18 = vmul.f32 %v2733_v12, %v781_v45  ;;  %v2738_v12 = vld [vmem:[#allocation80_spill] sm:$0xff] }
  0xc0   :  { %v2457_v63 = vmul.f32 %v2735_v0, %v781_v45  ;;  %v1111_v7 = vadd.f32 %v1079_v48, %v2337_v61  ;;  %v1139_v56 = vmax.f32 %v1107_v3, 0.0  ;;  %v2461_v52 = vmul.f32 %v2737_v50, %v781_v45 }
  0xc1   :  { %2734 = vst [vmem:[#allocation23_spill] sm:$0xff] %v2454_v18  ;;  %v1112_v54 = vadd.f32 %v1080_v25, %v2340_v38  ;;  %v1140_v55 = vmax.f32 %v1108_v2, 0.0  ;;  %v1141_v37 = vmax.f32 %v1109_v49, 0.0  ;;  %v1113_v44 = vadd.f32 %v1081_v26, %v2343_v14 }
  0xc2   :  { %2736 = vst [vmem:[#allocation24_spill] sm:$0xff] %v2457_v63  ;;  %v1406_v62 = vmul.f32 -1.442695, %v1135_v31  ;;  %v1407_v21 = vmul.f32 -1.442695, %v1136_v51  ;;  %v2466_v18 = vmul.f32 %v2738_v12, %v781_v45  ;;  %v1114_v0 = vadd.f32 %v1082_v60, %v2346_v35 }
  0xc3   :  { %v1408_v20 = vmul.f32 -1.442695, %v1137_v36  ;;  %v1142_v63 = vmax.f32 %v1110_v1, 0.0  ;;  %v1409_v61 = vmul.f32 -1.442695, %v1138_v53  ;;  %v1115_v48 = vadd.f32 %v1083_v27, %v2349_v13 }
  0xc4   :  { %v1143_v3 = vmax.f32 %v1111_v7, 0.0  ;;  %1447 = vpow2.f32 %v1406_v62  ;;  %v1410_v50 = vmul.f32 -1.442695, %v1139_v56  ;;  %v1116_v38 = vadd.f32 %v1084_v30, %v2352_v11 }
  0xc5   :  { %v1144_v25 = vmax.f32 %v1112_v54, 0.0  ;;  %1449 = vpow2.f32 %v1407_v21  ;;  %v1411_v14 = vmul.f32 -1.442695, %v1140_v55  ;;  %v1117_v26 = vadd.f32 %v1085_v16, %v2355_v9 }
  0xc6   :  { %v1145_v2 = vmax.f32 %v1113_v44, 0.0  ;;  %1451 = vpow2.f32 %v1408_v20  ;;  %v1412_v45 = vmul.f32 -1.442695, %v1141_v37  ;;  %v1118_v49 = vadd.f32 %v1086_v5, %v2358_v22 }
  0xc7   :  { %v1146_v35 = vmax.f32 %v1114_v0, 0.0  ;;  %1453 = vpow2.f32 %v1409_v61  ;;  %v1413_v60 = vmul.f32 -1.442695, %v1142_v63  ;;  %v1119_v13 = vadd.f32 %v1087_v15, %v2361_v34 }
  0xc8   :  { %v1147_v27 = vmax.f32 %v1115_v48, 0.0  ;;  %1455 = vpow2.f32 %v1410_v50  ;;  %v1414_v31 = vmul.f32 -1.442695, %v1143_v3  ;;  %v1120_v11 = vadd.f32 %v1088_v57, %v2364_v6  ;;  %v2740_v0 = vld [vmem:[#allocation23_spill] sm:$0xff] }
  0xc9   :  { %v1148_v30 = vmax.f32 %v1116_v38, 0.0  ;;  %1457 = vpow2.f32 %v1411_v14  ;;  %v1415_v51 = vmul.f32 -1.442695, %v1144_v25  ;;  %v1121_v9 = vadd.f32 %v1089_v33, %v2367_v39  ;;  %v2742_v50 = vld [vmem:[#allocation24_spill] sm:$0xff] }
  0xca   :  { %v1149_v16 = vmax.f32 %v1117_v26, 0.0  ;;  %1459 = vpow2.f32 %v1412_v45  ;;  %v1416_v36 = vmul.f32 -1.442695, %v1145_v2  ;;  %v1122_v22 = vadd.f32 %v1090_v8, %v2370_v59 }
  0xcb   :  { %v1150_v5 = vmax.f32 %v1118_v49, 0.0  ;;  %1461 = vpow2.f32 %v1413_v60  ;;  %v1417_v1 = vmul.f32 -1.442695, %v1146_v35  ;;  %v1123_v34 = vadd.f32 %v2429_v17, %v2373_v10  ;;  %v2744_v35 = vld [vmem:[#allocation22_spill] sm:$0xff] }
  0xcc   :  { %v1151_v15 = vmax.f32 %v1119_v13, 0.0  ;;  %1463 = vpow2.f32 %v1414_v31  ;;  %v1418_v53 = vmul.f32 -1.442695, %v1147_v27  ;;  %v1124_v6 = vadd.f32 %v2432_v58, %v2376_v43 }
  0xcd   :  { %v1152_v57 = vmax.f32 %v1120_v11, 0.0  ;;  %1465 = vpow2.f32 %v1415_v51  ;;  %v1419_v39 = vmul.f32 -1.442695, %v1148_v30  ;;  %v1125_v59 = vadd.f32 %v2435_v19, %v2379_v40 }
  0xce   :  { %v2481_v33 = vpop.eup %1447  ;;  %v1153_v8 = vmax.f32 %v1121_v9, 0.0  ;;  %1467 = vpow2.f32 %v1416_v36  ;;  %v1420_v63 = vmul.f32 -1.442695, %v1149_v16  ;;  %v1126_v10 = vadd.f32 %v2438_v41, %v2382_v32 }
  0xcf   :  { %v2485_v7 = vpop.eup %1449  ;;  %v1154_v17 = vmax.f32 %v1122_v22, 0.0  ;;  %1469 = vpow2.f32 %v1417_v1  ;;  %v1421_v56 = vmul.f32 -1.442695, %v1150_v5  ;;  %v1127_v58 = vadd.f32 %v2441_v4, %v2385_v23 }
  0xd0   :  { %v2489_v43 = vpop.eup %1451  ;;  %v1155_v54 = vmax.f32 %v1123_v34, 0.0  ;;  %1471 = vpow2.f32 %v1418_v53  ;;  %v1422_v55 = vmul.f32 -1.442695, %v1151_v15  ;;  %v1128_v19 = vadd.f32 %v2444_v46, %v2388_v28  ;;  %v2739_v46 = vld [vmem:[#allocation19_spill] sm:$0xff] }
  0xd1   :  { %v2493_v40 = vpop.eup %1453  ;;  %v1156_v37 = vmax.f32 %v1124_v6, 0.0  ;;  %1473 = vpow2.f32 %v1419_v39  ;;  %v1423_v44 = vmul.f32 -1.442695, %v1152_v57  ;;  %v1129_v41 = vadd.f32 %v2447_v47, %v2391_v24  ;;  %v2741_v47 = vld [vmem:[#allocation20_spill] sm:$0xff] }
  0xd2   :  { %v2497_v32 = vpop.eup %1455  ;;  %v1157_v62 = vmax.f32 %v1125_v59, 0.0  ;;  %1475 = vpow2.f32 %v1420_v63  ;;  %v1424_v21 = vmul.f32 -1.442695, %v1153_v8  ;;  %v1130_v4 = vadd.f32 %v2450_v42, %v2394_v29  ;;  %v2743_v42 = vld [vmem:[#allocation21_spill] sm:$0xff] }
  0xd3   :  { %v2501_v23 = vpop.eup %1457  ;;  %v1158_v20 = vmax.f32 %v1126_v10, 0.0  ;;  %1477 = vpow2.f32 %v1421_v56  ;;  %v1425_v12 = vmul.f32 -1.442695, %v1154_v17  ;;  %v1131_v61 = vadd.f32 %v2740_v0, %v2739_v46 }
  0xd4   :  { %v2505_v28 = vpop.eup %1459  ;;  %v1159_v48 = vmax.f32 %v1127_v58, 0.0  ;;  %1479 = vpow2.f32 %v1422_v55  ;;  %v1426_v3 = vmul.f32 -1.442695, %v1155_v54  ;;  %v1132_v38 = vadd.f32 %v2742_v50, %v2741_v47 }
  0xd5   :  { %v2509_v24 = vpop.eup %1461  ;;  %v1160_v25 = vmax.f32 %v1128_v19, 0.0  ;;  %1481 = vpow2.f32 %v1423_v44  ;;  %v1427_v14 = vmul.f32 -1.442695, %v1156_v37  ;;  %v1133_v26 = vadd.f32 %v2461_v52, %v2743_v42 }
  0xd6   :  { %v1464_v29 = vpop.eup %1463  ;;  %v1161_v2 = vmax.f32 %v1129_v41, 0.0  ;;  %1483 = vpow2.f32 %v1424_v21  ;;  %v1428_v45 = vmul.f32 -1.442695, %v1157_v62  ;;  %v1134_v60 = vadd.f32 %v2466_v18, %v2744_v35 }
  0xd7   :  { %v1466_v49 = vpop.eup %1465  ;;  %v1162_v13 = vmax.f32 %v1130_v4, 0.0  ;;  %1485 = vpow2.f32 %v1425_v12  ;;  %v1429_v27 = vmul.f32 -1.442695, %v1158_v20  ;;  %v1163_v11 = vmax.f32 %v1131_v61, 0.0 }
  0xd8   :  { %v1468_v31 = vpop.eup %1467  ;;  %1487 = vpow2.f32 %v1426_v3  ;;  %v1430_v30 = vmul.f32 -1.442695, %v1159_v48  ;;  %v1164_v9 = vmax.f32 %v1132_v38, 0.0  ;;  %v1431_v16 = vmul.f32 -1.442695, %v1160_v25 }
  0xd9   :  { %v1470_v51 = vpop.eup %1469  ;;  %1489 = vpow2.f32 %v1427_v14  ;;  %v1165_v52 = vmax.f32 %v1133_v26, 0.0  ;;  %v1432_v22 = vmul.f32 -1.442695, %v1161_v2  ;;  %v1166_v1 = vmax.f32 %v1134_v60, 0.0 }
  0xda   :  { %v1472_v36 = vpop.eup %1471  ;;  %1491 = vpow2.f32 %v1428_v45  ;;  %v1433_v34 = vmul.f32 -1.442695, %v1162_v13  ;;  %v1434_v15 = vmul.f32 -1.442695, %v1163_v11  ;;  %v1435_v6 = vmul.f32 -1.442695, %v1164_v9 }
  0xdb   :  { %v1474_v5 = vpop.eup %1473  ;;  %1493 = vpow2.f32 %v1429_v27  ;;  %v1436_v39 = vmul.f32 -1.442695, %v1165_v52  ;;  %v1437_v8 = vmul.f32 -1.442695, %v1166_v1  ;;  %v1263_v10 = vadd.f32 1.0, %v2481_v33 }
  0xdc   :  { %v1476_v18 = vpop.eup %1475  ;;  %1495 = vpow2.f32 %v1430_v30  ;;  %v1264_v56 = vadd.f32 1.0, %v2485_v7  ;;  %v1265_v54 = vadd.f32 1.0, %v2489_v43  ;;  %v1266_v19 = vadd.f32 1.0, %v2493_v40 }
  0xdd   :  { %v1478_v53 = vpop.eup %1477  ;;  %1497 = vpow2.f32 %v1431_v16  ;;  %v1267_v44 = vadd.f32 1.0, %v2497_v32  ;;  %v1268_v62 = vadd.f32 1.0, %v2501_v23  ;;  %v1269_v7 = vadd.f32 1.0, %v2505_v28 }
  0xde   :  { %v1480_v57 = vpop.eup %1479  ;;  %1499 = vpow2.f32 %v1432_v22  ;;  %v1270_v43 = vadd.f32 1.0, %v2509_v24  ;;  %v1271_v40 = vadd.f32 1.0, %v1464_v29  ;;  %v1272_v20 = vadd.f32 1.0, %v1466_v49 }
  0xdf   :  { %v1482_v59 = vpop.eup %1481  ;;  %1501 = vpow2.f32 %v1433_v34  ;;  %v1273_v12 = vadd.f32 1.0, %v1468_v31  ;;  %v1274_v28 = vadd.f32 1.0, %v1470_v51  ;;  %v1275_v61 = vadd.f32 1.0, %v1472_v36 }
  0xe0   :  { %v1484_v63 = vpop.eup %1483  ;;  %1503 = vpow2.f32 %v1434_v15  ;;  %v1276_v3 = vadd.f32 1.0, %v1474_v5  ;;  %v1277_v47 = vadd.f32 1.0, %v1476_v18  ;;  %v1278_v38 = vadd.f32 1.0, %v1478_v53 }
  0xe1   :  { %v1486_v17 = vpop.eup %1485  ;;  %1505 = vpow2.f32 %v1435_v6  ;;  %v1279_v14 = vadd.f32 1.0, %v1480_v57  ;;  %v1280_v42 = vadd.f32 1.0, %v1482_v59  ;;  %v1281_v2 = vadd.f32 1.0, %v1484_v63 }
  0xe2   :  { %v1488_v58 = vpop.eup %1487  ;;  %1507 = vpow2.f32 %v1436_v39  ;;  %v1282_v49 = vadd.f32 1.0, %v1486_v17 }
  0xe3   :  { %v1490_v55 = vpop.eup %1489  ;;  %1509 = vpow2.f32 %v1437_v8  ;;  %v1283_v60 = vadd.f32 1.0, %v1488_v58 }
  0xe4   :  { %v1492_v37 = vpop.eup %1491  ;;  %1511 = vrcp.f32 %v1263_v10  ;;  %v1284_v27 = vadd.f32 1.0, %v1490_v55 }
  0xe5   :  { %v1494_v41 = vpop.eup %1493  ;;  %1513 = vrcp.f32 %v1264_v56  ;;  %v1285_v11 = vadd.f32 1.0, %v1492_v37 }
  0xe6   :  { %v2523_v33 = vpop.eup %1495  ;;  %1515 = vrcp.f32 %v1265_v54  ;;  %v1286_v51 = vadd.f32 1.0, %v1494_v41 }
  0xe7   :  { %v2526_v21 = vpop.eup %1497  ;;  %1517 = vrcp.f32 %v1266_v19  ;;  %v1287_v16 = vadd.f32 1.0, %v2523_v33 }
  0xe8   :  { %v2529_v4 = vpop.eup %1499  ;;  %1519 = vrcp.f32 %v1267_v44  ;;  %v1288_v52 = vadd.f32 1.0, %v2526_v21 }
  0xe9   :  { %v2531_v32 = vpop.eup %1501  ;;  %1521 = vrcp.f32 %v1268_v62  ;;  %v1289_v5 = vadd.f32 1.0, %v2529_v4 }
  0xea   :  { %v2533_v23 = vpop.eup %1503  ;;  %1523 = vrcp.f32 %v1269_v7  ;;  %v1290_v34 = vadd.f32 1.0, %v2531_v32 }
  0xeb   :  { %v2535_v46 = vpop.eup %1505  ;;  %1525 = vrcp.f32 %v1270_v43  ;;  %v1291_v15 = vadd.f32 1.0, %v2533_v23 }
  0xec   :  { %v2537_v0 = vpop.eup %1507  ;;  %1527 = vrcp.f32 %v1271_v40  ;;  %v1292_v6 = vadd.f32 1.0, %v2535_v46 }
  0xed   :  { %v2539_v48 = vpop.eup %1509  ;;  %1529 = vrcp.f32 %v1272_v20  ;;  %v1293_v39 = vadd.f32 1.0, %v2537_v0 }
  0xee   :  { %v1512_v24 = vpop.eup %1511  ;;  %1531 = vrcp.f32 %v1273_v12  ;;  %v1294_v8 = vadd.f32 1.0, %v2539_v48 }
  0xef   :  { %v1514_v50 = vpop.eup %1513  ;;  %1533 = vrcp.f32 %v1274_v28  ;;  %1359 = vst [vmem:[#allocation5] sm:$0xff] %v1512_v24 }
  0xf0   :  { %v1516_v25 = vpop.eup %1515  ;;  %1535 = vrcp.f32 %v1275_v61  ;;  %1360 = vst [vmem:[#allocation5 + $0x8] sm:$0xff] %v1514_v50 }
  0xf1   :  { %v1518_v29 = vpop.eup %1517  ;;  %1537 = vrcp.f32 %v1276_v3  ;;  %1361 = vst [vmem:[#allocation5 + $0x10] sm:$0xff] %v1516_v25 }
  0xf2   :  { %v1520_v26 = vpop.eup %1519  ;;  %1539 = vrcp.f32 %v1277_v47  ;;  %1362 = vst [vmem:[#allocation5 + $0x18] sm:$0xff] %v1518_v29 }
  0xf3   :  { %v1522_v45 = vpop.eup %1521  ;;  %1541 = vrcp.f32 %v1278_v38  ;;  %1363 = vst [vmem:[#allocation5 + $0x20] sm:$0xff] %v1520_v26 }
  0xf4   :  { %v1524_v35 = vpop.eup %1523  ;;  %1543 = vrcp.f32 %v1279_v14  ;;  %1364 = vst [vmem:[#allocation5 + $0x28] sm:$0xff] %v1522_v45 }
  0xf5   :  { %v1526_v13 = vpop.eup %1525  ;;  %1545 = vrcp.f32 %v1280_v42  ;;  %1365 = vst [vmem:[#allocation5 + $0x30] sm:$0xff] %v1524_v35 }
  0xf6   :  { %v1528_v31 = vpop.eup %1527  ;;  %1547 = vrcp.f32 %v1281_v2  ;;  %1366 = vst [vmem:[#allocation5 + $0x38] sm:$0xff] %v1526_v13 }
  0xf7   :  { %v1530_v30 = vpop.eup %1529  ;;  %1549 = vrcp.f32 %v1282_v49  ;;  %1367 = vst [vmem:[#allocation5 + $0x40] sm:$0xff] %v1528_v31 }
  0xf8   :  { %v1532_v9 = vpop.eup %1531  ;;  %1551 = vrcp.f32 %v1283_v60  ;;  %1368 = vst [vmem:[#allocation5 + $0x48] sm:$0xff] %v1530_v30 }
  0xf9   :  { %v1534_v36 = vpop.eup %1533  ;;  %1553 = vrcp.f32 %v1284_v27  ;;  %1369 = vst [vmem:[#allocation5 + $0x50] sm:$0xff] %v1532_v9 }
  0xfa   :  { %v1536_v22 = vpop.eup %1535  ;;  %1555 = vrcp.f32 %v1285_v11  ;;  %1370 = vst [vmem:[#allocation5 + $0x58] sm:$0xff] %v1534_v36 }
  0xfb   :  { %v1538_v1 = vpop.eup %1537  ;;  %1557 = vrcp.f32 %v1286_v51  ;;  %1371 = vst [vmem:[#allocation5 + $0x60] sm:$0xff] %v1536_v22 }
  0xfc   :  { %v1540_v18 = vpop.eup %1539  ;;  %1559 = vrcp.f32 %v1287_v16  ;;  %1372 = vst [vmem:[#allocation5 + $0x68] sm:$0xff] %v1538_v1 }
  0xfd   :  { %v1542_v53 = vpop.eup %1541  ;;  %1561 = vrcp.f32 %v1288_v52  ;;  %1373 = vst [vmem:[#allocation5 + $0x70] sm:$0xff] %v1540_v18 }
  0xfe   :  { %v1544_v57 = vpop.eup %1543  ;;  %1563 = vrcp.f32 %v1289_v5  ;;  %1374 = vst [vmem:[#allocation5 + $0x78] sm:$0xff] %v1542_v53 }
  0xff   :  { %v1546_v59 = vpop.eup %1545  ;;  %1565 = vrcp.f32 %v1290_v34  ;;  %1375 = vst [vmem:[#allocation5 + $0x80] sm:$0xff] %v1544_v57 }
 0x100   :  { %v1548_v63 = vpop.eup %1547  ;;  %1567 = vrcp.f32 %v1291_v15  ;;  %1376 = vst [vmem:[#allocation5 + $0x88] sm:$0xff] %v1546_v59 }
 0x101   :  { %v1550_v10 = vpop.eup %1549  ;;  %1569 = vrcp.f32 %v1292_v6  ;;  %1377 = vst [vmem:[#allocation5 + $0x90] sm:$0xff] %v1548_v63 }
 0x102   :  { %v1552_v17 = vpop.eup %1551  ;;  %1571 = vrcp.f32 %v1293_v39  ;;  %1378 = vst [vmem:[#allocation5 + $0x98] sm:$0xff] %v1550_v10 }
 0x103   :  { %v1554_v56 = vpop.eup %1553  ;;  %1573 = vrcp.f32 %v1294_v8  ;;  %1379 = vst [vmem:[#allocation5 + $0xa0] sm:$0xff] %v1552_v17 }
 0x104   :  { %v1556_v58 = vpop.eup %1555  ;;  %1380 = vst [vmem:[#allocation5 + $0xa8] sm:$0xff] %v1554_v56 }
 0x105   :  { %v1558_v54 = vpop.eup %1557  ;;  %1381 = vst [vmem:[#allocation5 + $0xb0] sm:$0xff] %v1556_v58 }
 0x106   :  { %v1560_v55 = vpop.eup %1559  ;;  %1382 = vst [vmem:[#allocation5 + $0xb8] sm:$0xff] %v1558_v54 }
 0x107   :  { %v1562_v19 = vpop.eup %1561  ;;  %1383 = vst [vmem:[#allocation5 + $0xc0] sm:$0xff] %v1560_v55 }
 0x108   :  { %v1564_v37 = vpop.eup %1563  ;;  %1384 = vst [vmem:[#allocation5 + $0xc8] sm:$0xff] %v1562_v19 }
 0x109   :  { %v1566_v44 = vpop.eup %1565  ;;  %1385 = vst [vmem:[#allocation5 + $0xd0] sm:$0xff] %v1564_v37 }
 0x10a   :  { %v1568_v41 = vpop.eup %1567  ;;  %1386 = vst [vmem:[#allocation5 + $0xd8] sm:$0xff] %v1566_v44 }
 0x10b   :  { %v1570_v62 = vpop.eup %1569  ;;  %1387 = vst [vmem:[#allocation5 + $0xe0] sm:$0xff] %v1568_v41 }
 0x10c   :  { %v1572_v33 = vpop.eup %1571  ;;  %1388 = vst [vmem:[#allocation5 + $0xe8] sm:$0xff] %v1570_v62 }
 0x10d   :  { %v1574_v7 = vpop.eup %1573  ;;  %1389 = vst [vmem:[#allocation5 + $0xf0] sm:$0xff] %v1572_v33 }
 0x10e   :  { %1390 = vst [vmem:[#allocation5 + $0xf8] sm:$0xff] %v1574_v7 }
 0x10f   :  { %1608 = shalt.err (!%p1605_p12)
}
 0x110   :  { %s1609_s30 = scalar_lea.hbm %s2564_s3, 4096 }
 0x111   :  { %p1610_p13 = scmp.ne.s32.totalorder %s2564_s3, %s1609_s30  ;;  %p1613_p0 = scmp.lt.u32.totalorder %s1609_s30, %s2564_s3 }
 0x113   :  { %p1615_p1 = pnand %p1613_p0, %p1610_p13 }
 0x115   :  { %1618 = shalt.err (!%p1615_p1)
}
 0x116   :  { %1400 = dma.vmem_to_hbm [thread:$0]  %s1398_s1, 4096, %s2564_s3, [#allocation4]  }
 0x117   :  { %1621 = dma.done.wait [#allocation4], 4096  }
 0x118   :  { %1622 = vsyncadd [#allocation4], 4294963200 }
 0x119   :  { %1404 = vsyncpa [#allocation3], 1 }
 0x11a   :  { %1405 = vsyncpa [#allocation4], 1 }

</bundles_post_ra>
